<compile_context>
chip_gen: v6e
topology: v6e:2x2x1
jax: 0.10.0
libtpu: 0.0.40
codegen_flags: <defaults>
</compile_context>

<pallas_src>
import functools

import jax
import jax.numpy as jnp
from jax.experimental import pallas as pl
from jax.experimental.pallas import tpu as pltpu


def _multiview_kernel(x_ref, wfT_ref, bfT_ref, woT_ref, boT_ref,
                      out_ref, aux_ref, *, inv_p):
    """Grid = (B, P // tp).  One (batch element, pixel tile) per step.

    x_ref   : (1, N, Cin, tp)  all camera views, one pixel tile (pixels on lanes)
    wfT_ref : (Cf, Cin)        feature-extractor 1x1 conv weight (transposed)
    bfT_ref : (Cf, 1)          feature-extractor bias (column)
    woT_ref : (Cout, Cf)       output-head 1x1 conv weight (transposed)
    boT_ref : (Cout, 1)        output-head bias (column)
    out_ref : (1, Cout, tp)    overall result tile (lane-dense, maps back to NCHW)
    aux_ref : (1, Cf, N)       per-camera pooled features (resident across pixel tiles,
                               used as the accumulator for the spatial mean)
    """
    p_idx = pl.program_id(1)
    n_p = pl.num_programs(1)
    n_cam = x_ref.shape[1]

    wfT = wfT_ref[...]                                    # (Cf, Cin)
    bfT = bfT_ref[...]                                    # (Cf, 1)

    agg = None
    pooled = []
    # N is tiny and static -> unrolled loop; plain 2-D MXU matmuls, running max
    # over cameras kept in registers (no scratch, no cross-step camera phases).
    for n in range(n_cam):
        xn = x_ref[0, n]                                  # (Cin, tp)
        feat = jnp.dot(wfT, xn,
                       preferred_element_type=jnp.float32) + bfT
        feat = jnp.maximum(feat, 0.0)                     # ReLU, (Cf, tp)
        pooled.append(jnp.sum(feat, axis=1, keepdims=True))     # (Cf, 1) partial sum
        agg = feat if agg is None else jnp.maximum(agg, feat)   # max over cameras

    partial = jnp.concatenate(pooled, axis=1)             # (Cf, N) partial pixel-sums

    # aux accumulation directly in the resident output block (same block index
    # across the pixel axis), finalize the mean on the last pixel tile.
    @pl.when(p_idx == 0)
    def _():
        aux_ref[0] = partial

    @pl.when(p_idx > 0)
    def _():
        aux_ref[0] = aux_ref[0] + partial

    @pl.when(p_idx == n_p - 1)
    def _():
        aux_ref[0] = aux_ref[0] * inv_p

    # output head on the aggregated features (lane-dense (Cout, tp) store)
    out = jnp.dot(woT_ref[...], agg,
                  preferred_element_type=jnp.float32) + boT_ref[...]
    out_ref[0] = out.astype(out_ref.dtype)


@functools.partial(jax.jit, static_argnames=("compute_dtype", "pixel_tile"))
def multiview_forward(imgs_nchw, wf, bf, wo, bo, *,
                      compute_dtype=jnp.float32, pixel_tile=1024):
    """imgs_nchw: [B, N_cam, C, H, W]  (PyTorch NCHW per camera).

    Returns (overall_res [B, Cout, H, W], aux_res [B, N_cam, Cf]) — same tuple
    structure as MultiviewBase.forward.

    compute_dtype=jnp.bfloat16 can be used on v6e/v7x to halve matmul-input DMA
    traffic (accumulation stays f32; test tolerance must then be relaxed).
    pixel_tile bounds the per-step VMEM footprint for large H*W.
    """
    B, N, Cin, H, W = imgs_nchw.shape
    P = H * W
    Cf = wf.shape[1]
    Cout = wo.shape[1]

    # Pixel-axis tile: multiple of 128 that divides P (fall back to full P).
    if P % 128 == 0:
        tp = min(int(pixel_tile), P)
        tp = max(128, (tp // 128) * 128)
        while P % tp != 0:
            tp -= 128
    else:
        tp = P
    n_p = P // tp

    # No layout transpose: the NCHW flatten already puts pixels on lanes.
    x = imgs_nchw.reshape(B, N, Cin, P).astype(compute_dtype)
    wfT = jnp.transpose(wf).astype(compute_dtype)          # (Cf, Cin)
    woT = jnp.transpose(wo).astype(compute_dtype)          # (Cout, Cf)
    bfT = bf.reshape(Cf, 1).astype(jnp.float32)            # (Cf, 1)
    boT = bo.reshape(Cout, 1).astype(jnp.float32)          # (Cout, 1)

    grid_spec = pltpu.PrefetchScalarGridSpec(
        num_scalar_prefetch=0,
        grid=(B, n_p),
        in_specs=[
            pl.BlockSpec((1, N, Cin, tp), lambda b, p: (b, 0, 0, p)),
            pl.BlockSpec((Cf, Cin), lambda b, p: (0, 0)),
            pl.BlockSpec((Cf, 1), lambda b, p: (0, 0)),
            pl.BlockSpec((Cout, Cf), lambda b, p: (0, 0)),
            pl.BlockSpec((Cout, 1), lambda b, p: (0, 0)),
        ],
        out_specs=[
            pl.BlockSpec((1, Cout, tp), lambda b, p: (b, 0, p)),
            pl.BlockSpec((1, Cf, N), lambda b, p: (b, 0, 0)),
        ],
    )

    kernel = functools.partial(_multiview_kernel, inv_p=float(1.0 / P))

    overall_flat, aux_cfn = pl.pallas_call(
        kernel,
        out_shape=(
            jax.ShapeDtypeStruct((B, Cout, P), jnp.float32),
            jax.ShapeDtypeStruct((B, Cf, N), jnp.float32),
        ),
        grid_spec=grid_spec,
        compiler_params=pltpu.CompilerParams(
            dimension_semantics=("parallel", "arbitrary")),
    )(x, wfT, bfT, woT, boT)

    # Straight reshape back to NCHW (no transpose needed for the overall result).
    overall_res = overall_flat.reshape(B, Cout, H, W)
    # aux is tiny (B * Cf * N elements); transpose to the (B, N, Cf) interface.
    aux_res = jnp.transpose(aux_cfn, (0, 2, 1))
    return overall_res, aux_res


if __name__ == "__main__":
    # small shapes consistent with the module: multi-camera NCHW images
    B, N_CAM, C_IN, H, W = 2, 3, 4, 16, 16
    C_FEAT, C_OUT = 32, 8

    key = jax.random.PRNGKey(0)
    k_img, k_wf, k_bf, k_wo, k_bo = jax.random.split(key, 5)

    imgs = jax.random.normal(k_img, (B, N_CAM, C_IN, H, W), dtype=jnp.float32)
    wf = jax.random.normal(k_wf, (C_IN, C_FEAT), dtype=jnp.float32) * 0.1
    bf = jax.random.normal(k_bf, (1, C_FEAT), dtype=jnp.float32) * 0.1
    wo = jax.random.normal(k_wo, (C_FEAT, C_OUT), dtype=jnp.float32) * 0.1
    bo = jax.random.normal(k_bo, (1, C_OUT), dtype=jnp.float32) * 0.1

    # pixel_tile=128 -> 2 pixel tiles per batch element: exercises both the
    # pipelined pixel axis and the cross-tile aux accumulation path.
    overall_res, aux_res = multiview_forward(imgs, wf, bf, wo, bo, pixel_tile=128)
    jax.block_until_ready((overall_res, aux_res))

    # pure-JAX reference check (same pixels-on-lanes formulation)
    x_r = imgs.reshape(B, N_CAM, C_IN, H * W)                     # (B,N,Cin,P)
    feat_r = jnp.einsum("fc,bncp->bnfp", jnp.transpose(wf), x_r)  # (B,N,Cf,P)
    feat_r = jnp.maximum(feat_r + bf.reshape(1, 1, C_FEAT, 1), 0.0)
    aux_r = jnp.mean(feat_r, axis=-1)                             # (B,N,Cf)
    agg_r = jnp.max(feat_r, axis=1)                               # (B,Cf,P)
    out_r = jnp.einsum("of,bfp->bop", jnp.transpose(wo), agg_r)
    out_r = (out_r + bo.reshape(1, C_OUT, 1)).reshape(B, C_OUT, H, W)

    assert jnp.allclose(overall_res, out_r, atol=1e-4, rtol=1e-4)
    assert jnp.allclose(aux_res, aux_r, atol=1e-4, rtol=1e-4)
    print("KERNEL_OK")
</pallas_src>

<mosaic_0001>
module attributes {stable_mosaic.version = 11 : i64} {
  func.func @_multiview_kernel(%arg0: i32, %arg1: i32, %arg2: memref<1x3x4x128xf32, #tpu.memory_space<vmem>>, %arg3: memref<32x4xf32, #tpu.memory_space<vmem>>, %arg4: memref<32x1xf32, #tpu.memory_space<vmem>>, %arg5: memref<8x32xf32, #tpu.memory_space<vmem>>, %arg6: memref<8x1xf32, #tpu.memory_space<vmem>>, %arg7: memref<1x8x128xf32, #tpu.memory_space<vmem>>, %arg8: memref<1x32x3xf32, #tpu.memory_space<vmem>>) attributes {dimension_semantics = [#tpu.dimension_semantics<parallel>, #tpu.dimension_semantics<arbitrary>], iteration_bounds = array<i64: 2, 2>, scalar_prefetch = 0 : i64, scratch_operands = 0 : i64, tpu.core_type = #tpu.core_type<tc>, window_params = [{transform_indices = @transform_0, window_bounds = array<i64: 1, 3, 4, 128>}, {pipeline_mode = #tpu.pipeline_mode<synchronous>, transform_indices = @transform_1, window_bounds = array<i64: 32, 4>}, {pipeline_mode = #tpu.pipeline_mode<synchronous>, transform_indices = @transform_2, window_bounds = array<i64: 32, 1>}, {pipeline_mode = #tpu.pipeline_mode<synchronous>, transform_indices = @transform_3, window_bounds = array<i64: 8, 32>}, {pipeline_mode = #tpu.pipeline_mode<synchronous>, transform_indices = @transform_4, window_bounds = array<i64: 8, 1>}, {transform_indices = @transform_5, window_bounds = array<i64: 1, 8, 128>}, {transform_indices = @transform_6, window_bounds = array<i64: 1, 32, 3>}]} {
    %c0 = arith.constant 0 : index
    %c0_0 = arith.constant 0 : index
    %0 = vector.load %arg3[%c0, %c0_0] : memref<32x4xf32, #tpu.memory_space<vmem>>, vector<32x4xf32>
    %c0_1 = arith.constant 0 : index
    %c0_2 = arith.constant 0 : index
    %1 = vector.load %arg4[%c0_1, %c0_2] : memref<32x1xf32, #tpu.memory_space<vmem>>, vector<32x1xf32>
    %c0_3 = arith.constant 0 : index
    %c0_4 = arith.constant 0 : index
    %c0_5 = arith.constant 0 : index
    %c0_6 = arith.constant 0 : index
    %2 = vector.load %arg2[%c0_3, %c0_4, %c0_5, %c0_6] : memref<1x3x4x128xf32, #tpu.memory_space<vmem>>, vector<1x1x4x128xf32>
    %3 = vector.shape_cast %2 : vector<1x1x4x128xf32> to vector<4x128xf32>
    %cst = arith.constant dense<0.000000e+00> : vector<32x128xf32>
    %4 = tpu.matmul %0, %3, %cst {dimension_numbers = #tpu.dot_dimension_numbers<[1], [0], [0], [1], [0, 0, 1, 1], [], []>} : vector<32x4xf32>, vector<4x128xf32>, vector<32x128xf32> -> vector<32x128xf32>
    %5 = vector.broadcast %1 : vector<32x1xf32> to vector<32x128xf32>
    %6 = arith.addf %4, %5 : vector<32x128xf32>
    %cst_7 = arith.constant 0.000000e+00 : f32
    %7 = vector.broadcast %cst_7 : f32 to vector<32x128xf32>
    %8 = arith.maximumf %6, %7 : vector<32x128xf32>
    %cst_8 = arith.constant dense<0.000000e+00> : vector<32xf32>
    %9 = vector.multi_reduction <add>, %8, %cst_8 [1] : vector<32x128xf32> to vector<32xf32>
    %10 = vector.shape_cast %9 : vector<32xf32> to vector<32x1xf32>
    %c0_9 = arith.constant 0 : index
    %c1 = arith.constant 1 : index
    %c0_10 = arith.constant 0 : index
    %c0_11 = arith.constant 0 : index
    %11 = vector.load %arg2[%c0_9, %c1, %c0_10, %c0_11] : memref<1x3x4x128xf32, #tpu.memory_space<vmem>>, vector<1x1x4x128xf32>
    %12 = vector.shape_cast %11 : vector<1x1x4x128xf32> to vector<4x128xf32>
    %cst_12 = arith.constant dense<0.000000e+00> : vector<32x128xf32>
    %13 = tpu.matmul %0, %12, %cst_12 {dimension_numbers = #tpu.dot_dimension_numbers<[1], [0], [0], [1], [0, 0, 1, 1], [], []>} : vector<32x4xf32>, vector<4x128xf32>, vector<32x128xf32> -> vector<32x128xf32>
    %14 = vector.broadcast %1 : vector<32x1xf32> to vector<32x128xf32>
    %15 = arith.addf %13, %14 : vector<32x128xf32>
    %cst_13 = arith.constant 0.000000e+00 : f32
    %16 = vector.broadcast %cst_13 : f32 to vector<32x128xf32>
    %17 = arith.maximumf %15, %16 : vector<32x128xf32>
    %cst_14 = arith.constant dense<0.000000e+00> : vector<32xf32>
    %18 = vector.multi_reduction <add>, %17, %cst_14 [1] : vector<32x128xf32> to vector<32xf32>
    %19 = vector.shape_cast %18 : vector<32xf32> to vector<32x1xf32>
    %20 = arith.maximumf %8, %17 : vector<32x128xf32>
    %c0_15 = arith.constant 0 : index
    %c2 = arith.constant 2 : index
    %c0_16 = arith.constant 0 : index
    %c0_17 = arith.constant 0 : index
    %21 = vector.load %arg2[%c0_15, %c2, %c0_16, %c0_17] : memref<1x3x4x128xf32, #tpu.memory_space<vmem>>, vector<1x1x4x128xf32>
    %22 = vector.shape_cast %21 : vector<1x1x4x128xf32> to vector<4x128xf32>
    %cst_18 = arith.constant dense<0.000000e+00> : vector<32x128xf32>
    %23 = tpu.matmul %0, %22, %cst_18 {dimension_numbers = #tpu.dot_dimension_numbers<[1], [0], [0], [1], [0, 0, 1, 1], [], []>} : vector<32x4xf32>, vector<4x128xf32>, vector<32x128xf32> -> vector<32x128xf32>
    %24 = vector.broadcast %1 : vector<32x1xf32> to vector<32x128xf32>
    %25 = arith.addf %23, %24 : vector<32x128xf32>
    %cst_19 = arith.constant 0.000000e+00 : f32
    %26 = vector.broadcast %cst_19 : f32 to vector<32x128xf32>
    %27 = arith.maximumf %25, %26 : vector<32x128xf32>
    %cst_20 = arith.constant dense<0.000000e+00> : vector<32xf32>
    %28 = vector.multi_reduction <add>, %27, %cst_20 [1] : vector<32x128xf32> to vector<32xf32>
    %29 = vector.shape_cast %28 : vector<32xf32> to vector<32x1xf32>
    %30 = arith.maximumf %20, %27 : vector<32x128xf32>
    %31 = tpu.concatenate %10, %19, %29 in 1 : vector<32x1xf32>, vector<32x1xf32>, vector<32x1xf32> -> vector<32x3xf32>
    %c0_i32 = arith.constant 0 : i32
    %32 = arith.cmpi eq, %arg1, %c0_i32 : i32
    %33 = arith.extui %32 : i1 to i32
    %c0_i32_21 = arith.constant 0 : i32
    %34 = arith.cmpi ne, %33, %c0_i32_21 : i32
    scf.if %34 {
      %c0_33 = arith.constant 0 : index
      %c0_34 = arith.constant 0 : index
      %c0_35 = arith.constant 0 : index
      %49 = vector.load %arg8[%c0_33, %c0_34, %c0_35] : memref<1x32x3xf32, #tpu.memory_space<vmem>>, vector<1x32x3xf32>
      %50 = vector.shape_cast %49 : vector<1x32x3xf32> to vector<32x3xf32>
      %51 = vector.shape_cast %31 : vector<32x3xf32> to vector<1x32x3xf32>
      tpu.vector_store %arg8[%c0_33, %c0_34, %c0_35], %51 {strides = array<i32>} : memref<1x32x3xf32, #tpu.memory_space<vmem>>, vector<1x32x3xf32>,
    } else {
    }
    %c0_i32_22 = arith.constant 0 : i32
    %35 = arith.cmpi sgt, %arg1, %c0_i32_22 : i32
    %36 = arith.extui %35 : i1 to i32
    %c0_i32_23 = arith.constant 0 : i32
    %37 = arith.cmpi ne, %36, %c0_i32_23 : i32
    scf.if %37 {
      %c0_33 = arith.constant 0 : index
      %c0_34 = arith.constant 0 : index
      %c0_35 = arith.constant 0 : index
      %49 = vector.load %arg8[%c0_33, %c0_34, %c0_35] : memref<1x32x3xf32, #tpu.memory_space<vmem>>, vector<1x32x3xf32>
      %50 = vector.shape_cast %49 : vector<1x32x3xf32> to vector<32x3xf32>
      %51 = arith.addf %50, %31 : vector<32x3xf32>
      %c0_36 = arith.constant 0 : index
      %c0_37 = arith.constant 0 : index
      %c0_38 = arith.constant 0 : index
      %52 = vector.load %arg8[%c0_36, %c0_37, %c0_38] : memref<1x32x3xf32, #tpu.memory_space<vmem>>, vector<1x32x3xf32>
      %53 = vector.shape_cast %52 : vector<1x32x3xf32> to vector<32x3xf32>
      %54 = vector.shape_cast %51 : vector<32x3xf32> to vector<1x32x3xf32>
      tpu.vector_store %arg8[%c0_36, %c0_37, %c0_38], %54 {strides = array<i32>} : memref<1x32x3xf32, #tpu.memory_space<vmem>>, vector<1x32x3xf32>,
    } else {
    }
    %c1_i32 = arith.constant 1 : i32
    %38 = arith.cmpi eq, %arg1, %c1_i32 : i32
    %39 = arith.extui %38 : i1 to i32
    %c0_i32_24 = arith.constant 0 : i32
    %40 = arith.cmpi ne, %39, %c0_i32_24 : i32
    scf.if %40 {
      %c0_33 = arith.constant 0 : index
      %c0_34 = arith.constant 0 : index
      %c0_35 = arith.constant 0 : index
      %49 = vector.load %arg8[%c0_33, %c0_34, %c0_35] : memref<1x32x3xf32, #tpu.memory_space<vmem>>, vector<1x32x3xf32>
      %50 = vector.shape_cast %49 : vector<1x32x3xf32> to vector<32x3xf32>
      %cst_36 = arith.constant 3.906250e-03 : f32
      %51 = vector.broadcast %cst_36 : f32 to vector<32x3xf32>
      %52 = arith.mulf %50, %51 : vector<32x3xf32>
      %c0_37 = arith.constant 0 : index
      %c0_38 = arith.constant 0 : index
      %c0_39 = arith.constant 0 : index
      %53 = vector.load %arg8[%c0_37, %c0_38, %c0_39] : memref<1x32x3xf32, #tpu.memory_space<vmem>>, vector<1x32x3xf32>
      %54 = vector.shape_cast %53 : vector<1x32x3xf32> to vector<32x3xf32>
      %55 = vector.shape_cast %52 : vector<32x3xf32> to vector<1x32x3xf32>
      tpu.vector_store %arg8[%c0_37, %c0_38, %c0_39], %55 {strides = array<i32>} : memref<1x32x3xf32, #tpu.memory_space<vmem>>, vector<1x32x3xf32>,
    } else {
    }
    %c0_25 = arith.constant 0 : index
    %c0_26 = arith.constant 0 : index
    %41 = vector.load %arg5[%c0_25, %c0_26] : memref<8x32xf32, #tpu.memory_space<vmem>>, vector<8x32xf32>
    %cst_27 = arith.constant dense<0.000000e+00> : vector<8x128xf32>
    %42 = tpu.matmul %41, %30, %cst_27 {dimension_numbers = #tpu.dot_dimension_numbers<[1], [0], [0], [1], [0, 0, 1, 1], [], []>} : vector<8x32xf32>, vector<32x128xf32>, vector<8x128xf32> -> vector<8x128xf32>
    %c0_28 = arith.constant 0 : index
    %c0_29 = arith.constant 0 : index
    %43 = vector.load %arg6[%c0_28, %c0_29] : memref<8x1xf32, #tpu.memory_space<vmem>>, vector<8x1xf32>
    %44 = vector.broadcast %43 : vector<8x1xf32> to vector<8x128xf32>
    %45 = arith.addf %42, %44 : vector<8x128xf32>
    %c0_30 = arith.constant 0 : index
    %c0_31 = arith.constant 0 : index
    %c0_32 = arith.constant 0 : index
    %46 = vector.load %arg7[%c0_30, %c0_31, %c0_32] : memref<1x8x128xf32, #tpu.memory_space<vmem>>, vector<1x8x128xf32>
    %47 = vector.shape_cast %46 : vector<1x8x128xf32> to vector<8x128xf32>
    %48 = vector.shape_cast %45 : vector<8x128xf32> to vector<1x8x128xf32>
    tpu.vector_store %arg7[%c0_30, %c0_31, %c0_32], %48 {strides = array<i32>} : memref<1x8x128xf32, #tpu.memory_space<vmem>>, vector<1x8x128xf32>,
    return
  }
  func.func @transform_0(%arg0: i32, %arg1: i32) -> (i32, i32, i32, i32) {
    %c0_i32 = arith.constant 0 : i32
    %c0_i32_0 = arith.constant 0 : i32
    %c0_i32_1 = arith.constant 0 : i32
    return %arg0, %c0_i32, %c0_i32_0, %arg1 : i32, i32, i32, i32
  }
  func.func @transform_1(%arg0: i32, %arg1: i32) -> (i32, i32) {
    %c0_i32 = arith.constant 0 : i32
    %c0_i32_0 = arith.constant 0 : i32
    %c0_i32_1 = arith.constant 0 : i32
    return %c0_i32, %c0_i32_0 : i32, i32
  }
  func.func @transform_2(%arg0: i32, %arg1: i32) -> (i32, i32) {
    %c0_i32 = arith.constant 0 : i32
    %c0_i32_0 = arith.constant 0 : i32
    %c0_i32_1 = arith.constant 0 : i32
    return %c0_i32, %c0_i32_0 : i32, i32
  }
  func.func @transform_3(%arg0: i32, %arg1: i32) -> (i32, i32) {
    %c0_i32 = arith.constant 0 : i32
    %c0_i32_0 = arith.constant 0 : i32
    %c0_i32_1 = arith.constant 0 : i32
    return %c0_i32, %c0_i32_0 : i32, i32
  }
  func.func @transform_4(%arg0: i32, %arg1: i32) -> (i32, i32) {
    %c0_i32 = arith.constant 0 : i32
    %c0_i32_0 = arith.constant 0 : i32
    %c0_i32_1 = arith.constant 0 : i32
    return %c0_i32, %c0_i32_0 : i32, i32
  }
  func.func @transform_5(%arg0: i32, %arg1: i32) -> (i32, i32, i32) {
    %c0_i32 = arith.constant 0 : i32
    %c0_i32_0 = arith.constant 0 : i32
    return %arg0, %c0_i32, %arg1 : i32, i32, i32
  }
  func.func @transform_6(%arg0: i32, %arg1: i32) -> (i32, i32, i32) {
    %c0_i32 = arith.constant 0 : i32
    %c0_i32_0 = arith.constant 0 : i32
    %c0_i32_1 = arith.constant 0 : i32
    return %arg0, %c0_i32, %c0_i32_0 : i32, i32, i32
  }
}

</mosaic_0001>

<bundles_post_ra>
// kernel: multiview_forward.1
= control target key start
LH: loop header
LB: loop body
LE: loop exit
PB: predicated region body
PF: predicated region fallthrough
CT: control target
= control target key end

     0   :  { %s1199_s21 = smov 0   ;;  %s1201_s22 = smov 0   ;;  %s1384_s0 = inlined_call_operand.vmem [shape: f32[2,3,4,256], index: 0, kind: input, shape index: {}]   ;;  %s1385_s1 = inlined_call_operand.vmem [shape: f32[32,4], index: 1, kind: input, shape index: {}]   ;;  %s1386_s2 = inlined_call_operand.vmem [shape: f32[32,1], index: 2, kind: input, shape index: {}]   ;;  %s1387_s3 = inlined_call_operand.vmem [shape: f32[8,32], index: 3, kind: input, shape index: {}]   ;;  %s1388_s4 = inlined_call_operand.vmem [shape: f32[8,1], index: 4, kind: input, shape index: {}]   ;;  %s1389_s5 = inlined_call_operand.vmem [shape: f32[2,8,256], index: 5, kind: output, shape index: {0}]   ;;  %s1390_s6 = inlined_call_operand.vmem [shape: f32[2,32,3], index: 6, kind: output, shape index: {1}]  }
   0x1   :  { %s1203_s23 = smov 0   ;;  %s1205_s24 = smov 0  }
   0x2   :  { %s1207_s25 = smov 0   ;;  %s1209_s26 = smov 0  }
   0x3   :  { %s1211_s27 = smov 0  }
   0x4 LB: > { %s26_s28 = sadd.s32 1, %s1151_s25  ;;  %s29_s29 = sadd.s32 1, %s1155_s26  ;;  %s1159_s27 = sphi %s1211_s27, %s17_s27   ;;  %s1155_s26 = sphi %s1209_s26, %s1396_s26   ;;  %s1151_s25 = sphi %s1207_s25, %s1395_s25   ;;  %s1147_s24 = sphi %s1205_s24, %s1394_s24   ;;  %s1143_s23 = sphi %s1203_s23, %s1393_s23   ;;  %s1139_s22 = sphi %s1201_s22, %s1392_s22   ;;  %s1135_s21 = sphi %s1199_s21, %s1391_s21  }
   0x5   : > { %p27_p0 = scmp.ge.s32.totalorder %s26_s28, 2  ;;  %p45_p1 = scmp.ne.s32.totalorder %s1139_s22, %s1135_s21 }
   0x6   : > { %p46_p2 = scmp.eq.s32.totalorder %s1159_s27, 0  ;;  %s38_s9 = sadd.s32 1, %s1139_s22 }
   0x7   : > { %s1398_s28 = smov (%p27_p0, %s26_s28), 0  ;;  %s1400_s29 = smov (!%p27_p0, %s29_s29), %s1155_s26 }
   0x8   : > { %p47_p3 = por %p46_p2, %p45_p1  ;;  %p31_p4 = scmp.ge.s32.totalorder %s1400_s29, 2 }
   0x9   : > { %s34_s30 = ssub.s32 %s1151_s25, %s1398_s28  ;;  %p954_p6 = scmp.ge.s32.totalorder %s1159_s27, 4 }
   0xa   : > { %s1402_s29 = smov (%p31_p4, %s1400_s29), 0 }
   0xb   : > { %s33_s7 = ssub.s32 %s1155_s26, %s1402_s29  ;;  %221 = sbr.rel (%p954_p6) target bundleno = 25 (0x19), region = 32 }
   0xc   : > { %s35_s8 = sor.u32 %s34_s30, %s33_s7 }
   0xd   : > { %p36_p5 = scmp.eq.s32.totalorder %s35_s8, 0 }
   0xf   : > { %s1250_s10 = scalar_select %p36_p5, %s1139_s22, %s38_s9  }
  0x10   : > { %224 = sbr.rel (!%p47_p3) target bundleno = 25 (0x19), region = 36  ;;  %s226_s11 = sand.u32 (%p47_p3), 1, %s1139_s22  }
  0x11   : > { %s1041_s12 = smul.u32 (%p47_p3), 6, %s1155_s26 }
  0x12   : > { %s1040_s13 = smul.u32 (%p47_p3), 12, %s226_s11 }
  0x13   : > { %s230_s14 = sadd.s32 (%p47_p3), %s1151_s25, %s1041_s12 }
  0x14   : > { %s955_s15 = sshll.u32 (%p47_p3), %s230_s14, 2  ;;  %s228_s19 = scalar_lea.vmem (%p47_p3), [#allocation2], %s1040_s13 }
  0x15   : > { %s232_s18 = scalar_lea.vmem %s1384_s0, %s955_s15 }
  0x16   : > { %v249_v0 = vld [vmem:[%s232_s18] sm:$0xf]  ;;  %v251_v1 = vld [vmem:[%s232_s18 + $0x8] sm:$0xf]  ;;  %v253_v2 = vld [vmem:[%s232_s18 + $0x10] sm:$0xf] }
  0x17   : > { %250 = vst [vmem:[%s228_s19] sm:$0xf] %v249_v0  ;;  %252 = vst [vmem:[%s228_s19 + $0x4] sm:$0xf] %v251_v1 }
  0x18   : > { %254 = vst [vmem:[%s228_s19 + $0x8] sm:$0xf] %v253_v2 }
  0x19 PF: > { %p956_p7 = scmp.ge.s32.totalorder %s1159_s27, 1  ;;  %p283_p8 = scmp.lt.s32.totalorder %s1159_s27, 5 }
  0x1b   : > { %p284_p9 = pnand %p956_p7, %p283_p8 }
  0x1c   : > { %s290_s20 = sand.u32 (!%p284_p9), 1, %s1135_s21   ;;  %p327_p10 = scmp.lt.s32.totalorder (!%p284_p9), %s1147_s24, 1 }
  0x1d   : > { %287 = sbr.rel (%p284_p9) target bundleno = 632 (0x278), region = 77  ;;  %p329_p11 = scmp.lt.s32.totalorder (!%p284_p9), %s1143_s23, 1 }
  0x1e   : > { %s1042_s8 = smul.u32 (!%p284_p9), 12, %s290_s20  ;;  %p978_p12 = scmp.ne.s32.totalorder (!%p284_p9), %s1143_s23, 0 }
  0x20   : > { %s292_s14 = scalar_lea.vmem (!%p284_p9), [#allocation2], %s1042_s8 }
  0x22   : > { %v340_v3 = vld [vmem:[%s1385_s1] sm:$0xff]  ;;  %vm369_vm0 = vcmask 31744   ;;  %s1404_s24 = smov (!%p327_p10, %s1147_s24), 1  ;;  %vm382_vm1 = vcmask 1043456   ;;  %v1161_v5 = vmov 0   ;;  %v346_v6 = vld [vmem:[%s1386_s2 + $0x10] sm:$0xff] }
  0x23   : > { %1007 = vmatprep.mubr.msk.f32.mxu0 %vm369_vm0, %v340_v3  ;;  %1015 = vmatprep.mubr.msk.f32.mxu1 %vm369_vm0, %v340_v3  ;;  %v344_v4 = vld [vmem:[%s1386_s2] sm:$0xff]  ;;  %s330_s13 = scalar_select %p329_p11, %s1143_s23, 1  ;;  %v341_v9 = vld [vmem:[%s1385_s1 + $0x8] sm:$0xff]  ;;  %v342_v10 = vld [vmem:[%s1385_s1 + $0x10] sm:$0xff]  ;;  %vm700_vm2 = vcmask 15360   ;;  %vm695_vm3 = vcmask 7168  }
  0x24   : > { %1102 = vset.pattern.permute.xlu0 %v1161_v5  ;;  %1103 = vset.pattern.permute.xlu1 %v1161_v5  ;;  %v348_v7 = vld [vmem:[%s292_s14] sm:$0xf]  ;;  %v966_v8 = vld [vmem:[%s292_s14 + $0x4] sm:$0xf]  ;;  %s957_s17 = sshll.u32 %s1404_s24, 1  ;;  %s984_s18 = sshll.u32 %s1404_s24, 5 }
  0x25   : > { %351 = vperm.xlu0 %1102, %v344_v4   ;;  %361 = vperm.xlu1 %1103, %v346_v6   ;;  %s332_s30 = sadd.s32 %s957_s17, %s330_s13  ;;  %s1290_s8 = scalar_lea.vmem %s1390_s6, %s984_s18  ;;  %v972_v11 = vld [vmem:[%s292_s14 + $0x8] sm:$0xf]  ;;  %v347_v13 = vld [vmem:[%s1386_s2 + $0x18] sm:$0xff] }
  0x26   : > { %1005 = vmatprep.subr.msk.mxu0 %vm382_vm1, %v348_v7  ;;  %1013 = vmatprep.subr.msk.mxu1 %vm382_vm1, %v966_v8  ;;  %v345_v12 = vld [vmem:[%s1386_s2 + $0x8] sm:$0xff]  ;;  %s958_s21 = sshll.u32 %s332_s30, 3  ;;  %v343_v14 = vld [vmem:[%s1385_s1 + $0x18] sm:$0xff] }
  0x27   : > { %1006 = vmatpush3.msk.msra.mxu0 %vm382_vm1, %v348_v7  ;;  %1014 = vmatpush3.msk.msra.mxu1 %vm382_vm1, %v966_v8  ;;  %s1305_s17 = scalar_lea.vmem %s1389_s5, %s958_s21 }
  0x28   : > { %1008 = vmatmul.mubr.msk.f32.vlgmr.msra.gmra.mxu0 %vm369_vm0, %v341_v9  ;;  %1016 = vmatmul.mubr.msk.f32.vlgmr.msra.gmra.mxu1 %vm369_vm0, %v341_v9 }
  0x29   : > { %1010 = vmatprep.mubr.msk.f32.mxu0 %vm369_vm0, %v342_v10  ;;  %1018 = vmatprep.mubr.msk.f32.mxu1 %vm369_vm0, %v342_v10 }
  0x2a   : > { %1021 = vmatprep.subr.msk.mxu0 %vm382_vm1, %v972_v11  ;;  %356 = vperm.xlu0 %1102, %v345_v12  }
  0x2b   : > { %1022 = vmatpush3.msk.msra.mxu0 %vm382_vm1, %v972_v11  ;;  %366 = vperm.xlu1 %1103, %v347_v13  }
  0x2c   : > { %1011 = vmatmul.mubr.msk.f32.gmra.mxu0 %vm369_vm0, %v343_v14  ;;  %1019 = vmatmul.mubr.msk.f32.gmra.mxu1 %vm369_vm0, %v343_v14 }
  0x2d   : > { %1023 = vmatprep.mubr.msk.f32.mxu0 %vm369_vm0, %v340_v3 }
  0x30   : > { %1024 = vmatmul.mubr.msk.f32.vlgmr.msra.gmra.mxu0 %vm369_vm0, %v341_v9 }
  0x31   : > { %1026 = vmatprep.mubr.msk.f32.mxu0 %vm369_vm0, %v342_v10 }
  0x34   : > { %1027 = vmatmul.mubr.msk.f32.gmra.mxu0 %vm369_vm0, %v343_v14 }
  0xa0   : > { %v352_v15 = vpop.permute.xlu0 %351  ;;  %v362_v16 = vpop.permute.xlu1 %361 }
  0xa5   : > { %v357_v17 = vpop.permute.xlu0 %356 }
  0xa6   : > { %v367_v22 = vpop.permute.xlu1 %366 }
  0xe8   : > { %v1009_v18 = vpop.f32.mrf.mxu0  ;;  %v1017_v19 = vpop.f32.mrf.mxu1 }
  0xe9   : > { %v458_v20 = vadd.f32 %v1009_v18, %v357_v17  ;;  %v560_v21 = vadd.f32 %v1017_v19, %v357_v17 }
  0xea   : > { %v452_v23 = vpop.f32.mrf.mxu0  ;;  %v554_v24 = vpop.f32.mrf.mxu1 }
  0xeb   : > { %v472_v25 = vmax.f32 %v458_v20, 0.0  ;;  %v574_v26 = vmax.f32 %v560_v21, 0.0  ;;  %v453_v27 = vadd.f32 %v452_v23, %v352_v15  ;;  %v555_v28 = vadd.f32 %v554_v24, %v352_v15 }
  0xec   : > { %v1012_v29 = vpop.f32.mrf.mxu0  ;;  %v1020_v30 = vpop.f32.mrf.mxu1 }
  0xed   : > { %v586_v31 = vmax.f32 %v472_v25, %v574_v26  ;;  %v471_v32 = vmax.f32 %v453_v27, 0.0  ;;  %v573_v33 = vmax.f32 %v555_v28, 0.0  ;;  %v468_v34 = vadd.f32 %v1012_v29, %v367_v22  ;;  %579 = vadd.xlane.f32.xlu0 %v574_v26  ;;  %477 = vadd.xlane.f32.xlu1 %v472_v25 }
  0xee   : > { %v570_v35 = vadd.f32 %v1020_v30, %v367_v22  ;;  %v462_v36 = vpop.f32.mrf.mxu0  ;;  %v564_v37 = vpop.f32.mrf.mxu1 }
  0xef   : > { %v585_v38 = vmax.f32 %v471_v32, %v573_v33  ;;  %v474_v39 = vmax.f32 %v468_v34, 0.0  ;;  %v463_v40 = vadd.f32 %v462_v36, %v362_v16  ;;  %v565_v41 = vadd.f32 %v564_v37, %v362_v16 }
  0xf0   : > { %v576_v42 = vmax.f32 %v570_v35, 0.0  ;;  %v1025_v43 = vpop.f32.mrf.mxu0 }
  0xf1   : > { %v473_v44 = vmax.f32 %v463_v40, 0.0  ;;  %v575_v45 = vmax.f32 %v565_v41, 0.0  ;;  %v666_v46 = vadd.f32 %v1025_v43, %v357_v17  ;;  %577 = vadd.xlane.f32.xlu1 %v573_v33  ;;  %475 = vadd.xlane.f32.xlu0 %v471_v32 }
  0xf2   : > { %v588_v47 = vmax.f32 %v474_v39, %v576_v42  ;;  %v660_v48 = vpop.f32.mrf.mxu0 }
  0xf3   : > { %v587_v49 = vmax.f32 %v473_v44, %v575_v45  ;;  %v680_v50 = vmax.f32 %v666_v46, 0.0  ;;  %v661_v51 = vadd.f32 %v660_v48, %v352_v15 }
  0xf4   : > { %v1028_v52 = vpop.f32.mrf.mxu0 }
  0xf5   : > { %v1320_v53 = vmax.f32 %v586_v31, %v680_v50  ;;  %v679_v54 = vmax.f32 %v661_v51, 0.0  ;;  %v676_v55 = vadd.f32 %v1028_v52, %v367_v22  ;;  %581 = vadd.xlane.f32.xlu1 %v575_v45  ;;  %481 = vadd.xlane.f32.xlu0 %v474_v39 }
  0xf6   : > { %v670_v56 = vpop.f32.mrf.mxu0 }
  0xf7   : > { %v1322_v57 = vmax.f32 %v585_v38, %v679_v54  ;;  %v682_v58 = vmax.f32 %v676_v55, 0.0  ;;  %v671_v59 = vadd.f32 %v670_v56, %v362_v16 }
  0xf9   : > { %v1324_v60 = vmax.f32 %v588_v47, %v682_v58  ;;  %v681_v61 = vmax.f32 %v671_v59, 0.0  ;;  %683 = vadd.xlane.f32.xlu1 %v679_v54  ;;  %583 = vadd.xlane.f32.xlu0 %v576_v42 }
  0xfb   : > { %v1326_v62 = vmax.f32 %v587_v49, %v681_v61 }
  0xfd   : > { %687 = vadd.xlane.f32.xlu1 %v681_v61  ;;  %479 = vadd.xlane.f32.xlu0 %v473_v44 }
 0x101   : > { %685 = vadd.xlane.f32.xlu0 %v680_v50 }
 0x105   : > { %689 = vadd.xlane.f32.xlu0 %v682_v58 }
 0x176   : > { %v580_v63 = vpop.xlane.xlu0 %579  ;;  %v478_v0 = vpop.xlane.xlu1 %477 }
 0x177   : > { %v697_v14 = vsel %vm695_vm3, %v478_v0, %v580_v63 }
 0x17a   : > { %v578_v1 = vpop.xlane.xlu1 %577  ;;  %v476_v2 = vpop.xlane.xlu0 %475 }
 0x17b   : > { %v696_v6 = vsel %vm695_vm3, %v476_v2, %v578_v1 }
 0x17e   : > { %v582_v3 = vpop.xlane.xlu1 %581  ;;  %v482_v4 = vpop.xlane.xlu0 %481 }
 0x182   : > { %v684_v7 = vpop.xlane.xlu1 %683  ;;  %v584_v8 = vpop.xlane.xlu0 %583 }
 0x183   : > { %v701_v9 = vsel %vm700_vm2, %v696_v6, %v684_v7  ;;  %v699_v17 = vsel %vm695_vm3, %v482_v4, %v584_v8 }
 0x186   : > { %v688_v10 = vpop.xlane.xlu1 %687  ;;  %v480_v11 = vpop.xlane.xlu0 %479 }
 0x187   : > { %v698_v12 = vsel %vm695_vm3, %v480_v11, %v582_v3 }
 0x188   : > { %v703_v13 = vsel %vm700_vm2, %v698_v12, %v688_v10 }
 0x18a   : > { %v686_v15 = vpop.xlane.xlu0 %685 }
 0x18b   : > { %v702_v16 = vsel %vm700_vm2, %v697_v14, %v686_v15  ;;  %708 = sbr.rel (%p978_p12) target bundleno = 403 (0x193), region = 85 }
 0x18e   : > { %v690_v18 = vpop.xlane.xlu0 %689 }
 0x18f   : > { %v704_v19 = vsel %vm700_vm2, %v699_v17, %v690_v18 }
 0x190   : > { %vm709_vm4 = vcmask 23552  }
 0x191   : > { %710 = vst.msk [vmem:[%s1290_s8] sm:$0xff] %vm709_vm4, %v701_v9  ;;  %711 = vst.msk [vmem:[%s1290_s8 + $0x8] sm:$0xff] %vm709_vm4, %v702_v16 }
 0x192   : > { %712 = vst.msk [vmem:[%s1290_s8 + $0x10] sm:$0xff] %vm709_vm4, %v703_v13  ;;  %713 = vst.msk [vmem:[%s1290_s8 + $0x18] sm:$0xff] %vm709_vm4, %v704_v19 }
 0x193 PF: > { %p979_p13 = scmp.le.s32.totalorder %s1143_s23, 0 }
 0x195   : > { %717 = sbr.rel (%p979_p13) target bundleno = 415 (0x19f), region = 89 }
 0x19a   : > { %v718_v20 = vld [vmem:[%s1290_s8] sm:$0xff]  ;;  %vm726_vm5 = vcmask 23552   ;;  %v719_v21 = vld [vmem:[%s1290_s8 + $0x8] sm:$0xff]  ;;  %v720_v22 = vld [vmem:[%s1290_s8 + $0x10] sm:$0xff] }
 0x19b   : > { %v722_v23 = vadd.f32 %v718_v20, %v701_v9  ;;  %v723_v24 = vadd.f32 %v719_v21, %v702_v16  ;;  %v724_v25 = vadd.f32 %v720_v22, %v703_v13  ;;  %v721_v26 = vld [vmem:[%s1290_s8 + $0x18] sm:$0xff] }
 0x19c   : > { %v725_v27 = vadd.f32 %v721_v26, %v704_v19 }
 0x19d   : > { %727 = vst.msk [vmem:[%s1290_s8] sm:$0xff] %vm726_vm5, %v722_v23  ;;  %728 = vst.msk [vmem:[%s1290_s8 + $0x8] sm:$0xff] %vm726_vm5, %v723_v24 }
 0x19e   : > { %729 = vst.msk [vmem:[%s1290_s8 + $0x10] sm:$0xff] %vm726_vm5, %v724_v25  ;;  %730 = vst.msk [vmem:[%s1290_s8 + $0x18] sm:$0xff] %vm726_vm5, %v725_v27 }
 0x19f PF: > { %p980_p0 = scmp.ne.s32.totalorder %s1143_s23, 1 }
 0x1a1   : > { %734 = sbr.rel (%p980_p0) target bundleno = 427 (0x1ab), region = 93 }
 0x1a6   : > { %v735_v28 = vld [vmem:[%s1290_s8] sm:$0xff]  ;;  %vm743_vm6 = vcmask 23552   ;;  %v736_v29 = vld [vmem:[%s1290_s8 + $0x8] sm:$0xff]  ;;  %v737_v30 = vld [vmem:[%s1290_s8 + $0x10] sm:$0xff] }
 0x1a7   : > { %v739_v31 = vmul.f32 0.00390625, %v735_v28  ;;  %v740_v32 = vmul.f32 0.00390625, %v736_v29  ;;  %v741_v33 = vmul.f32 0.00390625, %v737_v30  ;;  %v738_v34 = vld [vmem:[%s1290_s8 + $0x18] sm:$0xff] }
 0x1a8   : > { %v742_v35 = vmul.f32 0.00390625, %v738_v34 }
 0x1a9   : > { %744 = vst.msk [vmem:[%s1290_s8] sm:$0xff] %vm743_vm6, %v739_v31  ;;  %745 = vst.msk [vmem:[%s1290_s8 + $0x8] sm:$0xff] %vm743_vm6, %v740_v32 }
 0x1aa   : > { %746 = vst.msk [vmem:[%s1290_s8 + $0x10] sm:$0xff] %vm743_vm6, %v741_v33  ;;  %747 = vst.msk [vmem:[%s1290_s8 + $0x18] sm:$0xff] %vm743_vm6, %v742_v35 }
 0x1ab PF: > { %1104 = vset.pattern.permute.xlu0 %v1161_v5  ;;  %v749_v36 = vld [vmem:[%s1388_s4] sm:$0xff]  ;;  %v1162_v37 = vmov 0.0   ;;  %vm1163_vm7 = vmmov 0   ;;  %vm755_vm8 = vcmask 261120  }
 0x1ac   : > { %1029 = vmatprep.subr.mxu1 %v1162_v37  ;;  %1037 = vmatprep.mubr.msk.f32.mxu1 %vm1163_vm7, %v1162_v37  ;;  %v748_v5 = vld [vmem:[%s1387_s3] sm:$0xff] }
 0x1ad   : > { %1030 = vmatpush3.msra.mxu1 %v1324_v60  ;;  %752 = vperm.xlu0 %1104, %v749_v36  }
 0x1ae   : > { %1031 = vmatprep.subr.mxu1 %v1162_v37 }
 0x1af   : > { %1032 = vmatpush3.msra.mxu1 %v1326_v62 }
 0x1b0   : > { %1033 = vmatprep.subr.mxu1 %v1162_v37 }
 0x1b1   : > { %1034 = vmatpush3.msra.mxu1 %v1320_v53 }
 0x1b2   : > { %1035 = vmatprep.subr.mxu1 %v1162_v37 }
 0x1b3   : > { %1036 = vmatpush3.msra.mxu1 %v1322_v57 }
 0x1b4   : > { %1038 = vmatmul.mubr.msk.f32.vlgmr.msra.gmra.mxu1 %vm755_vm8, %v748_v5 }
 0x228   : > { %v753_v38 = vpop.permute.xlu0 %752 }
 0x274   : > { %v825_v39 = vpop.f32.mrf.mxu1 }
 0x275   : > { %v826_v40 = vadd.f32 %v825_v39, %v753_v38 }
 0x276   : > { %v1039_v41 = vpop.f32.mrf.mxu1 }
 0x277   : > { %829 = vst [vmem:[%s1305_s17] sm:$0xff] %v826_v40 }
 0x278 PF: > { %s17_s27 = sadd.s32 1, %s1159_s27   ;;  %s1391_s21 = smov %s1139_s22 }
 0x279   : > { %p14_p1 = scmp.ge.s32.totalorder %s17_s27, 6   ;;  %s1392_s22 = smov %s1250_s10 }
 0x27a   : > { %s1393_s23 = smov %s1151_s25  ;;  %s1394_s24 = smov %s1155_s26 }
 0x27b   : > { %s1395_s25 = smov %s1398_s28  ;;  %s1396_s26 = smov %s1402_s29 }
 0x27c   :  { %16 = sbr.rel (!%p14_p1) target bundleno = 4 (0x4), region = 142 }

</bundles_post_ra>
